<compile_context>
chip_gen: v5e
topology: v5e:2x2
jax: 0.10.0
libtpu: 0.0.40
codegen_flags: <defaults>
</compile_context>

<pallas_src>
import functools

import jax
import jax.numpy as jnp
from jax.experimental import pallas as pl
from jax.experimental.pallas import tpu as pltpu


# ------------------------------ fused kernel -------------------------------

def _cnn_kernel(B, L, H,
                xu_ref, w1_ref, b1_ref, w2_ref, b2_ref,
                wf1_ref, bf1_ref, wf2_ref, bf2_ref, o_ref):
    # --- conv1 + folded BN1 + ReLU: K=3, Cin=1 -> VPU broadcast FMAs ---
    xu = xu_ref[...]                                    # (L*B, 3), row r = l*B + b
    w1 = w1_ref[...]                                    # (3, H), BN1 folded in
    a1 = (xu[:, 0:1] * w1[0:1, :]
          + xu[:, 1:2] * w1[1:2, :]
          + xu[:, 2:3] * w1[2:3, :]) + b1_ref[...]
    a1 = jnp.maximum(a1, 0.0)                           # (L*B, H)

    # --- conv2 + folded BN2 + ReLU: one K=3H matmul on an im2col slab ---
    # l-major rows => sequence shift == row shift by B; boundary rows are zero
    # (matches conv zero padding; a1 is post-ReLU so zeros are exact).
    zb = jnp.zeros((B, H), jnp.float32)
    a_m1 = jnp.concatenate([zb, a1[:-B, :]], axis=0)    # a1 at position l-1
    a_p1 = jnp.concatenate([a1[B:, :], zb], axis=0)     # a1 at position l+1
    a_cat = jnp.concatenate([a_m1, a1, a_p1], axis=1)   # (L*B, 3H)
    a2 = jnp.dot(a_cat, w2_ref[...],
                 preferred_element_type=jnp.float32) + b2_ref[...]
    a2 = jnp.maximum(a2, 0.0)                            # (L*B, H)

    # --- torch flatten (B, H, L) -> (B, H*L) == our (B, L*H) column order ---
    # Lane-axis concat of L static row slices; wf1 was pre-permuted at init to
    # the l*H + h column order, so no further relayout is needed.
    f = jnp.concatenate([a2[l * B:(l + 1) * B, :] for l in range(L)], axis=1)

    # --- fc1 + folded BN3 + ReLU, then fc2 ---
    h1 = jnp.dot(f, wf1_ref[...],
                 preferred_element_type=jnp.float32) + bf1_ref[...]
    h1 = jnp.maximum(h1, 0.0)
    o_ref[...] = jnp.dot(h1, wf2_ref[...],
                         preferred_element_type=jnp.float32) + bf2_ref[...]


# -------------------------------- wrapper -----------------------------------

_VMEM = pl.BlockSpec(memory_space=pltpu.MemorySpace.VMEM)


def cnn_forward(x, p):
    B, L = x.shape
    H = p["w1"].shape[1]
    O = p["wf2"].shape[1]

    # im2col of the 1-channel input (k=3, pad=1), rows ordered l-major (tiny XLA
    # glue on a (B, L) array; everything downstream is a single pallas_call).
    xp = jnp.pad(x, ((0, 0), (1, 1)))
    xu = jnp.stack([xp[:, :-2], xp[:, 1:-1], xp[:, 2:]], axis=-1)    # (B, L, 3)
    x_unf = jnp.transpose(xu, (1, 0, 2)).reshape(L * B, 3)           # (L*B, 3)

    # TODO(synk): for large B*L / H add a row grid ("parallel") plus a K grid over
    #             wf1 with an f32 accumulator (v7x 2-TC sharding / 64 MiB VMEM);
    #             at these toy shapes one gridless call is the fastest option.
    kernel = functools.partial(_cnn_kernel, B, L, H)
    return pl.pallas_call(
        kernel,
        out_shape=jax.ShapeDtypeStruct((B, O), jnp.float32),
        in_specs=[_VMEM] * 9,
        out_specs=_VMEM,
    )(x_unf, p["w1"], p["b1"], p["w2"], p["b2"],
      p["wf1"], p["bf1"], p["wf2"], p["bf2"])


# --------------------- deterministic parameter init ------------------------

def init_params(key, input_dim, hidden_dim, output_dim):
    L, H, O = input_dim, hidden_dim, output_dim
    k1, k2, k3, k4 = jax.random.split(key, 4)
    eps = 1e-5

    # PyTorch-shaped weights, kaiming_normal_(nonlinearity='relu'), zero biases.
    w1_t = jax.random.normal(k1, (H, 1, 3), jnp.float32) * jnp.sqrt(2.0 / 3.0)
    w2_t = jax.random.normal(k2, (H, H, 3), jnp.float32) * jnp.sqrt(2.0 / (H * 3))
    wf1_t = jax.random.normal(k3, (H, H * L), jnp.float32) * jnp.sqrt(2.0 / (H * L))
    wf2_t = jax.random.normal(k4, (O, H), jnp.float32) * jnp.sqrt(2.0 / H)

    # Eval-mode BatchNorm (running_mean=0, running_var=1, gamma=1, beta=0) folds
    # to a per-channel scale; with zero conv/fc biases the folded biases stay 0.
    scale = 1.0 / jnp.sqrt(1.0 + eps)

    p = dict(
        # conv1: (H,1,3) -> (3,H), BN1 folded
        w1=jnp.transpose(w1_t[:, 0, :], (1, 0)) * scale,
        b1=jnp.zeros((1, H), jnp.float32),
        # conv2: (Hout,Hin,3) -> (3*Hin, Hout) rows ordered [l-1 | l | l+1], BN2 folded
        w2=jnp.transpose(w2_t, (2, 1, 0)).reshape(3 * H, H) * scale,
        b2=jnp.zeros((1, H), jnp.float32),
        # fc1: torch flatten index is h*L+l, ours is l*H+h; BN3 folded
        wf1=jnp.transpose(wf1_t.reshape(H, H, L), (2, 1, 0)).reshape(L * H, H) * scale,
        bf1=jnp.zeros((1, H), jnp.float32),
        # fc2: (O,H) -> (H,O)
        wf2=jnp.transpose(wf2_t, (1, 0)),
        bf2=jnp.zeros((1, O), jnp.float32),
    )
    # keep torch-shaped copies for the pure-JAX reference
    ref = dict(w1_t=w1_t, w2_t=w2_t, wf1_t=wf1_t, wf2_t=wf2_t, scale=scale)
    return p, ref


def reference_forward(x, ref):
    """Pure-JAX reference mirroring the PyTorch forward (NCL layout, eval BN)."""
    B, L = x.shape
    scale = ref["scale"]
    xp = jnp.pad(x, ((0, 0), (1, 1)))
    xu = jnp.stack([xp[:, :-2], xp[:, 1:-1], xp[:, 2:]], axis=1)            # (B,3,L)
    c1 = jnp.einsum("hk,bkl->bhl", ref["w1_t"][:, 0, :], xu)
    a1 = jnp.maximum(c1 * scale, 0.0)                                        # (B,H,L)
    a1p = jnp.pad(a1, ((0, 0), (0, 0), (1, 1)))
    a1u = jnp.stack([a1p[..., :-2], a1p[..., 1:-1], a1p[..., 2:]], axis=2)   # (B,H,3,L)
    c2 = jnp.einsum("oik,bikl->bol", ref["w2_t"], a1u)
    a2 = jnp.maximum(c2 * scale, 0.0)                                        # (B,H,L)
    f = a2.reshape(B, -1)                                                    # torch flatten
    h1 = jnp.maximum((f @ ref["wf1_t"].T) * scale, 0.0)
    return h1 @ ref["wf2_t"].T


# --------------------------------- main ------------------------------------

if __name__ == "__main__":
    B, INPUT_DIM, HIDDEN_DIM, OUTPUT_DIM = 2, 16, 32, 8

    key = jax.random.PRNGKey(0)
    kparam, kx = jax.random.split(key)
    params, ref_params = init_params(kparam, INPUT_DIM, HIDDEN_DIM, OUTPUT_DIM)

    x = jax.random.normal(kx, (B, INPUT_DIM), jnp.float32)

    fwd = jax.jit(cnn_forward)
    out = jax.block_until_ready(fwd(x, params))
    assert out.shape == (B, OUTPUT_DIM) and out.dtype == jnp.float32

    expected = reference_forward(x, ref_params)
    assert jnp.allclose(out, expected, rtol=2e-2, atol=2e-2), "mismatch vs reference"

    print("KERNEL_OK")
</pallas_src>

<mosaic_0001>
module attributes {stable_mosaic.version = 11 : i64} {
  func.func @_cnn_kernel(%arg0: memref<32x3xf32, #tpu.memory_space<vmem>>, %arg1: memref<3x32xf32, #tpu.memory_space<vmem>>, %arg2: memref<1x32xf32, #tpu.memory_space<vmem>>, %arg3: memref<96x32xf32, #tpu.memory_space<vmem>>, %arg4: memref<1x32xf32, #tpu.memory_space<vmem>>, %arg5: memref<512x32xf32, #tpu.memory_space<vmem>>, %arg6: memref<1x32xf32, #tpu.memory_space<vmem>>, %arg7: memref<32x8xf32, #tpu.memory_space<vmem>>, %arg8: memref<1x8xf32, #tpu.memory_space<vmem>>, %arg9: memref<2x8xf32, #tpu.memory_space<vmem>>) attributes {dimension_semantics = [], scalar_prefetch = 0 : i64, scratch_operands = 0 : i64, tpu.core_type = #tpu.core_type<tc>} {
    %c0 = arith.constant 0 : index
    %c0_0 = arith.constant 0 : index
    %0 = vector.load %arg0[%c0, %c0_0] : memref<32x3xf32, #tpu.memory_space<vmem>>, vector<32x3xf32>
    %c0_1 = arith.constant 0 : index
    %c0_2 = arith.constant 0 : index
    %1 = vector.load %arg1[%c0_1, %c0_2] : memref<3x32xf32, #tpu.memory_space<vmem>>, vector<3x32xf32>
    %2 = vector.extract_strided_slice %0 {offsets = [0, 0], sizes = [32, 1], strides = [1, 1]} : vector<32x3xf32> to vector<32x1xf32>
    %3 = vector.extract_strided_slice %1 {offsets = [0, 0], sizes = [1, 32], strides = [1, 1]} : vector<3x32xf32> to vector<1x32xf32>
    %4 = vector.broadcast %2 : vector<32x1xf32> to vector<32x32xf32>
    %5 = vector.broadcast %3 : vector<1x32xf32> to vector<32x32xf32>
    %6 = arith.mulf %4, %5 : vector<32x32xf32>
    %7 = vector.extract_strided_slice %0 {offsets = [0, 1], sizes = [32, 1], strides = [1, 1]} : vector<32x3xf32> to vector<32x1xf32>
    %8 = vector.extract_strided_slice %1 {offsets = [1, 0], sizes = [1, 32], strides = [1, 1]} : vector<3x32xf32> to vector<1x32xf32>
    %9 = vector.broadcast %7 : vector<32x1xf32> to vector<32x32xf32>
    %10 = vector.broadcast %8 : vector<1x32xf32> to vector<32x32xf32>
    %11 = arith.mulf %9, %10 : vector<32x32xf32>
    %12 = arith.addf %6, %11 : vector<32x32xf32>
    %13 = vector.extract_strided_slice %0 {offsets = [0, 2], sizes = [32, 1], strides = [1, 1]} : vector<32x3xf32> to vector<32x1xf32>
    %14 = vector.extract_strided_slice %1 {offsets = [2, 0], sizes = [1, 32], strides = [1, 1]} : vector<3x32xf32> to vector<1x32xf32>
    %15 = vector.broadcast %13 : vector<32x1xf32> to vector<32x32xf32>
    %16 = vector.broadcast %14 : vector<1x32xf32> to vector<32x32xf32>
    %17 = arith.mulf %15, %16 : vector<32x32xf32>
    %18 = arith.addf %12, %17 : vector<32x32xf32>
    %c0_3 = arith.constant 0 : index
    %c0_4 = arith.constant 0 : index
    %19 = vector.load %arg2[%c0_3, %c0_4] : memref<1x32xf32, #tpu.memory_space<vmem>>, vector<1x32xf32>
    %20 = vector.broadcast %19 : vector<1x32xf32> to vector<32x32xf32>
    %21 = arith.addf %18, %20 : vector<32x32xf32>
    %cst = arith.constant 0.000000e+00 : f32
    %22 = vector.broadcast %cst : f32 to vector<32x32xf32>
    %23 = arith.maximumf %21, %22 : vector<32x32xf32>
    %cst_5 = arith.constant 0.000000e+00 : f32
    %24 = vector.broadcast %cst_5 : f32 to vector<2x32xf32>
    %25 = vector.extract_strided_slice %23 {offsets = [0, 0], sizes = [30, 32], strides = [1, 1]} : vector<32x32xf32> to vector<30x32xf32>
    %26 = tpu.concatenate %24, %25 in 0 : vector<2x32xf32>, vector<30x32xf32> -> vector<32x32xf32>
    %27 = vector.extract_strided_slice %23 {offsets = [2, 0], sizes = [30, 32], strides = [1, 1]} : vector<32x32xf32> to vector<30x32xf32>
    %28 = tpu.concatenate %27, %24 in 0 : vector<30x32xf32>, vector<2x32xf32> -> vector<32x32xf32>
    %29 = tpu.concatenate %26, %23, %28 in 1 : vector<32x32xf32>, vector<32x32xf32>, vector<32x32xf32> -> vector<32x96xf32>
    %c0_6 = arith.constant 0 : index
    %c0_7 = arith.constant 0 : index
    %30 = vector.load %arg3[%c0_6, %c0_7] : memref<96x32xf32, #tpu.memory_space<vmem>>, vector<96x32xf32>
    %cst_8 = arith.constant dense<0.000000e+00> : vector<32x32xf32>
    %31 = tpu.matmul %29, %30, %cst_8 {dimension_numbers = #tpu.dot_dimension_numbers<[1], [0], [0], [1], [0, 0, 1, 1], [], []>} : vector<32x96xf32>, vector<96x32xf32>, vector<32x32xf32> -> vector<32x32xf32>
    %c0_9 = arith.constant 0 : index
    %c0_10 = arith.constant 0 : index
    %32 = vector.load %arg4[%c0_9, %c0_10] : memref<1x32xf32, #tpu.memory_space<vmem>>, vector<1x32xf32>
    %33 = vector.broadcast %32 : vector<1x32xf32> to vector<32x32xf32>
    %34 = arith.addf %31, %33 : vector<32x32xf32>
    %cst_11 = arith.constant 0.000000e+00 : f32
    %35 = vector.broadcast %cst_11 : f32 to vector<32x32xf32>
    %36 = arith.maximumf %34, %35 : vector<32x32xf32>
    %37 = vector.extract_strided_slice %36 {offsets = [0, 0], sizes = [2, 32], strides = [1, 1]} : vector<32x32xf32> to vector<2x32xf32>
    %38 = vector.extract_strided_slice %36 {offsets = [2, 0], sizes = [2, 32], strides = [1, 1]} : vector<32x32xf32> to vector<2x32xf32>
    %39 = vector.extract_strided_slice %36 {offsets = [4, 0], sizes = [2, 32], strides = [1, 1]} : vector<32x32xf32> to vector<2x32xf32>
    %40 = vector.extract_strided_slice %36 {offsets = [6, 0], sizes = [2, 32], strides = [1, 1]} : vector<32x32xf32> to vector<2x32xf32>
    %41 = vector.extract_strided_slice %36 {offsets = [8, 0], sizes = [2, 32], strides = [1, 1]} : vector<32x32xf32> to vector<2x32xf32>
    %42 = vector.extract_strided_slice %36 {offsets = [10, 0], sizes = [2, 32], strides = [1, 1]} : vector<32x32xf32> to vector<2x32xf32>
    %43 = vector.extract_strided_slice %36 {offsets = [12, 0], sizes = [2, 32], strides = [1, 1]} : vector<32x32xf32> to vector<2x32xf32>
    %44 = vector.extract_strided_slice %36 {offsets = [14, 0], sizes = [2, 32], strides = [1, 1]} : vector<32x32xf32> to vector<2x32xf32>
    %45 = vector.extract_strided_slice %36 {offsets = [16, 0], sizes = [2, 32], strides = [1, 1]} : vector<32x32xf32> to vector<2x32xf32>
    %46 = vector.extract_strided_slice %36 {offsets = [18, 0], sizes = [2, 32], strides = [1, 1]} : vector<32x32xf32> to vector<2x32xf32>
    %47 = vector.extract_strided_slice %36 {offsets = [20, 0], sizes = [2, 32], strides = [1, 1]} : vector<32x32xf32> to vector<2x32xf32>
    %48 = vector.extract_strided_slice %36 {offsets = [22, 0], sizes = [2, 32], strides = [1, 1]} : vector<32x32xf32> to vector<2x32xf32>
    %49 = vector.extract_strided_slice %36 {offsets = [24, 0], sizes = [2, 32], strides = [1, 1]} : vector<32x32xf32> to vector<2x32xf32>
    %50 = vector.extract_strided_slice %36 {offsets = [26, 0], sizes = [2, 32], strides = [1, 1]} : vector<32x32xf32> to vector<2x32xf32>
    %51 = vector.extract_strided_slice %36 {offsets = [28, 0], sizes = [2, 32], strides = [1, 1]} : vector<32x32xf32> to vector<2x32xf32>
    %52 = vector.extract_strided_slice %36 {offsets = [30, 0], sizes = [2, 32], strides = [1, 1]} : vector<32x32xf32> to vector<2x32xf32>
    %53 = tpu.concatenate %37, %38, %39, %40, %41, %42, %43, %44, %45, %46, %47, %48, %49, %50, %51, %52 in 1 : vector<2x32xf32>, vector<2x32xf32>, vector<2x32xf32>, vector<2x32xf32>, vector<2x32xf32>, vector<2x32xf32>, vector<2x32xf32>, vector<2x32xf32>, vector<2x32xf32>, vector<2x32xf32>, vector<2x32xf32>, vector<2x32xf32>, vector<2x32xf32>, vector<2x32xf32>, vector<2x32xf32>, vector<2x32xf32> -> vector<2x512xf32>
    %c0_12 = arith.constant 0 : index
    %c0_13 = arith.constant 0 : index
    %54 = vector.load %arg5[%c0_12, %c0_13] : memref<512x32xf32, #tpu.memory_space<vmem>>, vector<512x32xf32>
    %cst_14 = arith.constant dense<0.000000e+00> : vector<2x32xf32>
    %55 = tpu.matmul %53, %54, %cst_14 {dimension_numbers = #tpu.dot_dimension_numbers<[1], [0], [0], [1], [0, 0, 1, 1], [], []>} : vector<2x512xf32>, vector<512x32xf32>, vector<2x32xf32> -> vector<2x32xf32>
    %c0_15 = arith.constant 0 : index
    %c0_16 = arith.constant 0 : index
    %56 = vector.load %arg6[%c0_15, %c0_16] : memref<1x32xf32, #tpu.memory_space<vmem>>, vector<1x32xf32>
    %57 = vector.broadcast %56 : vector<1x32xf32> to vector<2x32xf32>
    %58 = arith.addf %55, %57 : vector<2x32xf32>
    %cst_17 = arith.constant 0.000000e+00 : f32
    %59 = vector.broadcast %cst_17 : f32 to vector<2x32xf32>
    %60 = arith.maximumf %58, %59 : vector<2x32xf32>
    %c0_18 = arith.constant 0 : index
    %c0_19 = arith.constant 0 : index
    %61 = vector.load %arg7[%c0_18, %c0_19] : memref<32x8xf32, #tpu.memory_space<vmem>>, vector<32x8xf32>
    %cst_20 = arith.constant dense<0.000000e+00> : vector<2x8xf32>
    %62 = tpu.matmul %60, %61, %cst_20 {dimension_numbers = #tpu.dot_dimension_numbers<[1], [0], [0], [1], [0, 0, 1, 1], [], []>} : vector<2x32xf32>, vector<32x8xf32>, vector<2x8xf32> -> vector<2x8xf32>
    %c0_21 = arith.constant 0 : index
    %c0_22 = arith.constant 0 : index
    %63 = vector.load %arg8[%c0_21, %c0_22] : memref<1x8xf32, #tpu.memory_space<vmem>>, vector<1x8xf32>
    %64 = vector.broadcast %63 : vector<1x8xf32> to vector<2x8xf32>
    %65 = arith.addf %62, %64 : vector<2x8xf32>
    %c0_23 = arith.constant 0 : index
    %c0_24 = arith.constant 0 : index
    %66 = vector.load %arg9[%c0_23, %c0_24] : memref<2x8xf32, #tpu.memory_space<vmem>>, vector<2x8xf32>
    tpu.vector_store %arg9[%c0_23, %c0_24], %65 {strides = array<i32>} : memref<2x8xf32, #tpu.memory_space<vmem>>, vector<2x8xf32>,
    return
  }
}

</mosaic_0001>

<bundles_post_ra>
// kernel: cnn_forward.1
= control target key start
LH: loop header
LB: loop body
LE: loop exit
PB: predicated region body
PF: predicated region fallthrough
CT: control target
= control target key end

     0   :  { %v577_v1 = vmov 1   ;;  %v578_v2 = vmov 0   ;;  %v579_v3 = vmov 2   ;;  %s982_s0 = inlined_call_operand.vmem [shape: f32[32,3], index: 0, kind: input, shape index: {}]   ;;  %s983_s1 = inlined_call_operand.vmem [shape: f32[3,32], index: 1, kind: input, shape index: {}]   ;;  %s984_s2 = inlined_call_operand.vmem [shape: f32[1,32], index: 2, kind: input, shape index: {}]   ;;  %s985_s3 = inlined_call_operand.vmem [shape: f32[96,32], index: 3, kind: input, shape index: {}]   ;;  %s986_s4 = inlined_call_operand.vmem [shape: f32[1,32], index: 4, kind: input, shape index: {}]   ;;  %s987_s5 = inlined_call_operand.vmem [shape: f32[512,32], index: 5, kind: input, shape index: {}]   ;;  %s988_s6 = inlined_call_operand.vmem [shape: f32[1,32], index: 6, kind: input, shape index: {}]   ;;  %s989_s7 = inlined_call_operand.vmem [shape: f32[32,8], index: 7, kind: input, shape index: {}]   ;;  %s990_s8 = inlined_call_operand.vmem [shape: f32[1,8], index: 8, kind: input, shape index: {}]   ;;  %s991_s9 = inlined_call_operand.hbm [shape: f32[2,8], index: 9, kind: output, shape index: {}]  }
   0x1   :  { %v33_v0 = vld [vmem:[%s982_s0] sm:$0xff]  ;;  %524 = vset.pattern.permute.xlu1 %v577_v1  ;;  %523 = vset.pattern.permute.xlu0 %v578_v2 }
   0x2   :  { %64 = vperm.xlu1 %524, %v33_v0   ;;  %40 = vperm.xlu0 %523, %v33_v0  }
   0x3   :  { %525 = vset.pattern.permute.xlu2 %v579_v3 }
   0x4   :  { %14 = vsyncpa [#allocation3], 0  ;;  %89 = vperm.xlu2 %525, %v33_v0   ;;  %v34_v4 = vld [vmem:[%s982_s0 + $0x8] sm:$0xff]  ;;  %v35_v5 = vld [vmem:[%s982_s0 + $0x10] sm:$0xff]  ;;  %vm142_vm0 = vcmask 1045504   ;;  %vm129_vm1 = vcmask 1041408  }
   0x5   :  { %v36_v6 = vld [vmem:[%s982_s0 + $0x18] sm:$0xff]  ;;  %v37_v8 = vld [vmem:[%s983_s1] sm:$0x7]  ;;  %s580_s1 = smov 32   ;;  %vm182_vm2 = vcmask 523264   ;;  %vm177_vm3 = vcmask 261120  }
   0x6   :  { %v104_v9 = vperm.slane %v37_v8, 2  ;;  %v79_v10 = vperm.slane %v37_v8, 1  ;;  %v58_v11 = vperm.slane %v37_v8, 0  ;;  %v547_v19 = vld [vmem:[%s984_s2] ss:$0 sm:$0xff]  ;;  %s581_s2 = smov 64  }
   0x7   :  { %v193_v8 = vld [vmem:[%s985_s3 + $0x30] sm:$0xff]  ;;  %vm203_vm4 = vcmask 785408   ;;  %vm493_vm5 = vcmask 58368  }
   0xa   :  { %68 = vperm.xlu1 %524, %v34_v4   ;;  %45 = vperm.xlu0 %523, %v34_v4  }
   0xc   :  { %93 = vperm.xlu2 %525, %v34_v4   ;;  %v197_v4 = vld [vmem:[%s985_s3 + $0x50] sm:$0xff] }
  0x12   :  { %72 = vperm.xlu1 %524, %v35_v5   ;;  %50 = vperm.xlu0 %523, %v35_v5  }
  0x14   :  { %97 = vperm.xlu2 %525, %v35_v5   ;;  %v196_v5 = vld [vmem:[%s985_s3 + $0x48] sm:$0xff] }
  0x1a   :  { %76 = vperm.xlu1 %524, %v36_v6   ;;  %55 = vperm.xlu0 %523, %v36_v6  }
  0x1c   :  { %101 = vperm.xlu2 %525, %v36_v6   ;;  %v195_v6 = vld [vmem:[%s985_s3 + $0x40] sm:$0xff] }
  0x22   :  { %546 = vset.pattern.permute.xlu0 %v579_v3  ;;  %v198_v3 = vld [vmem:[%s985_s3 + $0x58] sm:$0xff] }
  0x23   :  { %220 = vmatpush.msra.mxu0 %v198_v3  ;;  %v328_v3 = vld [vmem:[%s987_s5 + $0x78] sm:$0xff] }
  0x24   :  { %381 = vmatpush.msra.mxu1 %v328_v3 }
  0x25   :  { %221 = vmatpush.msra.mxu0 %v197_v4  ;;  %v341_v4 = vld [vmem:[%s987_s5 + $0xe0] sm:$0xff] }
  0x27   :  { %222 = vmatpush.msra.mxu0 %v196_v5  ;;  %v357_v5 = vld [vmem:[%s987_s5 + $0x160] sm:$0xff] }
  0x29   :  { %223 = vmatpush.msra.mxu0 %v195_v6  ;;  %v327_v6 = vld [vmem:[%s987_s5 + $0x70] sm:$0xff] }
  0x2a   :  { %382 = vmatpush.msra.mxu1 %v327_v6 }
  0x5e   :  { %v90_v7 = vpop.permute.xlu2 %89 }
  0x5f   :  { %v105_v14 = vmul.f32 %v104_v9, %v90_v7  ;;  %v194_v7 = vld [vmem:[%s985_s3 + $0x38] sm:$0xff] }
  0x60   :  { %224 = vmatpush.msra.mxu0 %v194_v7  ;;  %v340_v7 = vld [vmem:[%s987_s5 + $0xd8] sm:$0xff] }
  0x62   :  { %225 = vmatpush.msra.mxu0 %v193_v8  ;;  %v356_v8 = vld [vmem:[%s987_s5 + $0x158] sm:$0xff] }
  0x66   :  { %v94_v17 = vpop.permute.xlu2 %93 }
  0x67   :  { %v106_v27 = vmul.f32 %v104_v9, %v94_v17 }
  0x6e   :  { %v98_v29 = vpop.permute.xlu2 %97 }
  0x6f   :  { %v107_v37 = vmul.f32 %v104_v9, %v98_v29 }
  0x74   :  { %v65_v12 = vpop.permute.xlu1 %64  ;;  %v41_v13 = vpop.permute.xlu0 %40 }
  0x75   :  { %v80_v15 = vmul.f32 %v79_v10, %v65_v12  ;;  %v59_v16 = vmul.f32 %v58_v11, %v41_v13  ;;  %v189_v12 = vld [vmem:[%s985_s3 + $0x10] sm:$0xff]  ;;  %v188_v13 = vld [vmem:[%s985_s3 + $0x8] sm:$0xff] }
  0x76   :  { %v102_v46 = vpop.permute.xlu2 %101 }
  0x77   :  { %v84_v18 = vadd.f32 %v80_v15, %v59_v16  ;;  %v108_v53 = vmul.f32 %v104_v9, %v102_v46  ;;  %v192_v9 = vld [vmem:[%s985_s3 + $0x28] sm:$0xff] }
  0x78   :  { %226 = vmatpush.msra.mxu0 %v192_v9  ;;  %v326_v9 = vld [vmem:[%s987_s5 + $0x68] sm:$0xff] }
  0x79   :  { %v109_v20 = vadd.f32 %v105_v14, %v84_v18  ;;  %v187_v14 = vld [vmem:[%s985_s3] sm:$0xff]  ;;  %383 = vmatpush.msra.mxu1 %v326_v9 }
  0x7b   :  { %v117_v21 = vadd.f32 %v547_v19, %v109_v20 }
  0x7c   :  { %v69_v22 = vpop.permute.xlu1 %68  ;;  %v46_v23 = vpop.permute.xlu0 %45 }
  0x7d   :  { %v81_v24 = vmul.f32 %v79_v10, %v69_v22  ;;  %v60_v25 = vmul.f32 %v58_v11, %v46_v23  ;;  %v652_v26 = vmax.f32 %v117_v21, 0.0 }
  0x7f   :  { %v85_v28 = vadd.f32 %v81_v24, %v60_v25  ;;  %152 = vrot.lane.b32.xlu0 %v652_v26, %s580_s1  ;;  %v143_v38 = vrot.slane %v652_v26, 2  ;;  %v130_v41 = vrot.slane %v652_v26, 6 }
  0x81   :  { %v110_v30 = vadd.f32 %v106_v27, %v85_v28  ;;  %v141_v16 = vsel %vm129_vm1, 0.0, %v130_v41 }
  0x83   :  { %v118_v31 = vadd.f32 %v547_v19, %v110_v30 }
  0x84   :  { %v73_v32 = vpop.permute.xlu1 %72  ;;  %v51_v33 = vpop.permute.xlu0 %50 }
  0x85   :  { %v82_v34 = vmul.f32 %v79_v10, %v73_v32  ;;  %v61_v35 = vmul.f32 %v58_v11, %v51_v33  ;;  %v122_v36 = vmax.f32 %v118_v31, 0.0 }
  0x87   :  { %v86_v39 = vadd.f32 %v82_v34, %v61_v35  ;;  %154 = vrot.lane.b32.xlu2 %v122_v36, %s580_s1  ;;  %v144_v40 = vrot.slane %v122_v36, 2  ;;  %v131_v42 = vrot.slane %v122_v36, 6  ;;  %v548_v34 = vld [vmem:[%s986_s4] ss:$0 sm:$0xff]  ;;  %v344_v35 = vld [vmem:[%s987_s5 + $0xf8] sm:$0xff]  ;;  %s582_s4 = smov 96  }
  0x88   :  { %v360_v36 = vld [vmem:[%s987_s5 + $0x178] sm:$0xff]  ;;  %401 = vmatpush.msra.mxu2 %v344_v35  ;;  %v371_v35 = vld [vmem:[%s987_s5 + $0x1d0] sm:$0xff] }
  0x89   :  { %v111_v43 = vadd.f32 %v107_v37, %v86_v39  ;;  %v145_v44 = vsel %vm142_vm0, %v143_v38, %v144_v40  ;;  %v661_v45 = vsel %vm129_vm1, %v130_v41, %v131_v42  ;;  %v343_v37 = vld [vmem:[%s987_s5 + $0xf0] sm:$0xff]  ;;  %421 = vmatpush.msra.mxu3 %v360_v36 }
  0x8a   :  { %165 = vrot.lane.b32.xlu1 %v145_v44, %s581_s2  ;;  %v359_v38 = vld [vmem:[%s987_s5 + $0x170] sm:$0xff]  ;;  %402 = vmatpush.msra.mxu2 %v343_v37  ;;  %v332_v37 = vld [vmem:[%s987_s5 + $0x98] sm:$0xff] }
  0x8b   :  { %v119_v47 = vadd.f32 %v547_v19, %v111_v43  ;;  %422 = vmatpush.msra.mxu3 %v359_v38  ;;  %v319_v36 = vld [vmem:[%s987_s5 + $0x30] sm:$0xff]  ;;  %v348_v38 = vld [vmem:[%s987_s5 + $0x118] sm:$0xff] }
  0x8c   :  { %v77_v48 = vpop.permute.xlu1 %76  ;;  %v56_v49 = vpop.permute.xlu0 %55 }
  0x8d   :  { %v83_v50 = vmul.f32 %v79_v10, %v77_v48  ;;  %v62_v51 = vmul.f32 %v58_v11, %v56_v49  ;;  %v123_v52 = vmax.f32 %v119_v47, 0.0  ;;  %v191_v10 = vld [vmem:[%s985_s3 + $0x20] sm:$0xff]  ;;  %v190_v11 = vld [vmem:[%s985_s3 + $0x18] sm:$0xff] }
  0x8e   :  { %227 = vmatpush.msra.mxu0 %v191_v10  ;;  %v339_v10 = vld [vmem:[%s987_s5 + $0xd0] sm:$0xff] }
  0x8f   :  { %v87_v54 = vadd.f32 %v83_v50, %v62_v51  ;;  %v146_v55 = vrot.slane %v123_v52, 2  ;;  %v133_v56 = vrot.slane %v123_v52, 6 }
  0x90   :  { %228 = vmatpush.msra.mxu0 %v190_v11  ;;  %v355_v11 = vld [vmem:[%s987_s5 + $0x150] sm:$0xff] }
  0x91   :  { %v112_v57 = vadd.f32 %v108_v53, %v87_v54  ;;  %v147_v58 = vsel %vm142_vm0, %v144_v40, %v146_v55  ;;  %v134_v59 = vsel %vm129_vm1, %v131_v42, %v133_v56 }
  0x92   :  { %156 = vrot.lane.b32.xlu1 %v123_v52, %s580_s1  ;;  %167 = vrot.lane.b32.xlu0 %v147_v58, %s581_s2 }
  0x93   :  { %v120_v60 = vadd.f32 %v547_v19, %v112_v57  ;;  %229 = vmatpush.msra.mxu0 %v189_v12  ;;  %v325_v12 = vld [vmem:[%s987_s5 + $0x60] sm:$0xff] }
  0x94   :  { %384 = vmatpush.msra.mxu1 %v325_v12 }
  0x95   :  { %v124_v61 = vmax.f32 %v120_v60, 0.0  ;;  %230 = vmatpush.msra.mxu0 %v188_v13  ;;  %v338_v13 = vld [vmem:[%s987_s5 + $0xc8] sm:$0xff] }
  0x97   :  { %v148_v62 = vrot.slane %v124_v61, 2  ;;  %v135_v63 = vrot.slane %v124_v61, 6  ;;  %231 = vmatpush.msra.mxu0 %v187_v14  ;;  %v354_v14 = vld [vmem:[%s987_s5 + $0x148] sm:$0xff] }
  0x99   :  { %v151_v0 = vsel %vm142_vm0, %v148_v62, 0.0  ;;  %v149_v1 = vsel %vm142_vm0, %v146_v55, %v148_v62  ;;  %v136_v2 = vsel %vm129_vm1, %v133_v56, %v135_v63 }
  0x9a   :  { %158 = vrot.lane.b32.xlu0 %v124_v61, %s580_s1  ;;  %171 = vrot.lane.b32.xlu1 %v151_v0, %s581_s2 }
  0x9b   :  { %169 = vrot.lane.b32.xlu2 %v149_v1, %s581_s2  ;;  %v342_v1 = vld [vmem:[%s987_s5 + $0xe8] sm:$0xff] }
  0x9c   :  { %403 = vmatpush.msra.mxu2 %v342_v1 }
  0x9e   :  { %404 = vmatpush.msra.mxu2 %v341_v4 }
  0xa0   :  { %405 = vmatpush.msra.mxu2 %v340_v7 }
  0xa2   :  { %406 = vmatpush.msra.mxu2 %v339_v10 }
  0xa4   :  { %407 = vmatpush.msra.mxu2 %v338_v13 }
  0xe1   :  { %v155_v20 = vpop.permute.xlu2 %154 }
  0xe2   :  { %v179_v21 = vsel %vm177_vm3, %v661_v45, %v155_v20  ;;  %v323_v20 = vld [vmem:[%s987_s5 + $0x50] sm:$0xff] }
  0xf1   :  { %v153_v15 = vpop.permute.xlu0 %152 }
  0xf2   :  { %v178_v17 = vsel %vm177_vm3, %v141_v16, %v153_v15  ;;  %v376_v15 = vld [vmem:[%s987_s5 + $0x1f8] sm:$0xff] }
  0xf3   :  { %v324_v16 = vld [vmem:[%s987_s5 + $0x58] sm:$0xff]  ;;  %441 = vmatpush.msrb.mxu0 %v376_v15 }
  0xf4   :  { %385 = vmatpush.msra.mxu1 %v324_v16 }
  0xf5   :  { %v170_v26 = vpop.permute.xlu2 %169 }
  0xf6   :  { %386 = vmatpush.msra.mxu1 %v323_v20 }
  0xfc   :  { %v166_v18 = vpop.permute.xlu1 %165 }
  0xfd   :  { %v183_v19 = vsel %vm182_vm2, %v178_v17, %v166_v18  ;;  %v337_v17 = vld [vmem:[%s987_s5 + $0xc0] sm:$0xff] }
  0xfe   :  { %511 = vmatmul.msk.f32.vlgmr.msra.gmra.mxu0 %vm203_vm4, %v183_v19  ;;  %v353_v18 = vld [vmem:[%s987_s5 + $0x140] sm:$0xff]  ;;  %v375_v19 = vld [vmem:[%s987_s5 + $0x1f0] sm:$0xff]  ;;  %408 = vmatpush.msra.mxu2 %v337_v17 }
  0xff   :  { %442 = vmatpush.msrb.mxu0 %v375_v19 }
 0x104   :  { %v168_v22 = vpop.permute.xlu0 %167  ;;  %v157_v24 = vpop.permute.xlu1 %156 }
 0x105   :  { %v184_v23 = vsel %vm182_vm2, %v179_v21, %v168_v22  ;;  %v180_v25 = vsel %vm177_vm3, %v134_v59, %v157_v24  ;;  %v336_v21 = vld [vmem:[%s987_s5 + $0xb8] sm:$0xff]  ;;  %v322_v24 = vld [vmem:[%s987_s5 + $0x48] sm:$0xff] }
 0x106   :  { %512 = vmatmul.msk.f32.gmra.mxu0 %vm203_vm4, %v184_v23  ;;  %v185_v27 = vsel %vm182_vm2, %v180_v25, %v170_v26  ;;  %v352_v22 = vld [vmem:[%s987_s5 + $0x138] sm:$0xff]  ;;  %v374_v23 = vld [vmem:[%s987_s5 + $0x1e8] sm:$0xff]  ;;  %v335_v25 = vld [vmem:[%s987_s5 + $0xb0] sm:$0xff]  ;;  %409 = vmatpush.msra.mxu2 %v336_v21 }
 0x107   :  { %v351_v26 = vld [vmem:[%s987_s5 + $0x130] sm:$0xff]  ;;  %443 = vmatpush.msrb.mxu0 %v374_v23  ;;  %387 = vmatpush.msra.mxu1 %v322_v24 }
 0x108   :  { %410 = vmatpush.msra.mxu2 %v335_v25 }
 0x10c   :  { %v159_v28 = vpop.permute.xlu0 %158  ;;  %v172_v29 = vpop.permute.xlu1 %171 }
 0x10d   :  { %v181_v30 = vsel %vm177_vm3, %v136_v2, %v159_v28  ;;  %v358_v2 = vld [vmem:[%s987_s5 + $0x168] sm:$0xff]  ;;  %v321_v28 = vld [vmem:[%s987_s5 + $0x40] sm:$0xff] }
 0x10e   :  { %513 = vmatmul.msk.f32.gmra.mxu0 %vm203_vm4, %v185_v27  ;;  %v186_v31 = vsel %vm182_vm2, %v181_v30, %v172_v29  ;;  %423 = vmatpush.msra.mxu3 %v358_v2  ;;  %v373_v27 = vld [vmem:[%s987_s5 + $0x1e0] sm:$0xff]  ;;  %v334_v29 = vld [vmem:[%s987_s5 + $0xa8] sm:$0xff] }
 0x10f   :  { %444 = vmatpush.msrb.mxu0 %v373_v27  ;;  %v350_v30 = vld [vmem:[%s987_s5 + $0x128] sm:$0xff]  ;;  %388 = vmatpush.msra.mxu1 %v321_v28  ;;  %v464_v27 = vld [vmem:[%s989_s7 + $0x10] sm:$0xff]  ;;  %v462_v28 = vld [vmem:[%s989_s7] sm:$0xff] }
 0x110   :  { %424 = vmatpush.msra.mxu3 %v357_v5  ;;  %411 = vmatpush.msra.mxu2 %v334_v29  ;;  %v549_v29 = vld [vmem:[%s988_s6] ss:$0 sm:$0xff]  ;;  %s502_s6 = sshll.u32 %s991_s9, 4  ;;  %s503_s6 = int_to_ptr.hbm [resolvable:$true] %s502_s6 }
 0x112   :  { %425 = vmatpush.msra.mxu3 %v356_v8 }
 0x114   :  { %426 = vmatpush.msra.mxu3 %v355_v11 }
 0x116   :  { %514 = vmatmul.msk.f32.gmra.mxu0 %vm203_vm4, %v186_v31  ;;  %427 = vmatpush.msra.mxu3 %v354_v14  ;;  %v372_v31 = vld [vmem:[%s987_s5 + $0x1d8] sm:$0xff] }
 0x117   :  { %445 = vmatpush.msrb.mxu0 %v372_v31 }
 0x118   :  { %428 = vmatpush.msra.mxu3 %v353_v18 }
 0x119   :  { %446 = vmatpush.msrb.mxu0 %v371_v35 }
 0x11a   :  { %429 = vmatpush.msra.mxu3 %v352_v22 }
 0x11c   :  { %430 = vmatpush.msra.mxu3 %v351_v26 }
 0x11e   :  { %431 = vmatpush.msra.mxu3 %v350_v30 }
 0x17b   :  { %v233_v32 = vpop.f32.mrf.mxu0 }
 0x17c   :  { %v234_v44 = vadd.f32 %v548_v34, %v233_v32  ;;  %v320_v32 = vld [vmem:[%s987_s5 + $0x38] sm:$0xff] }
 0x17d   :  { %389 = vmatpush.msra.mxu1 %v320_v32 }
 0x17e   :  { %v749_v55 = vmax.f32 %v234_v44, 0.0  ;;  %v347_v44 = vld [vmem:[%s987_s5 + $0x110] sm:$0xff] }
 0x17f   :  { %390 = vmatpush.msra.mxu1 %v319_v36 }
 0x180   :  { %v250_v58 = vrot.slane %v749_v55, 2  ;;  %v258_v60 = vrot.slane %v749_v55, 6  ;;  %v254_v61 = vrot.slane %v749_v55, 4 }
 0x183   :  { %v236_v33 = vpop.f32.mrf.mxu0 }
 0x184   :  { %v237_v39 = vadd.f32 %v548_v34, %v236_v33  ;;  %v333_v33 = vld [vmem:[%s987_s5 + $0xa0] sm:$0xff] }
 0x185   :  { %412 = vmatpush.msra.mxu2 %v333_v33 }
 0x186   :  { %v739_v40 = vmax.f32 %v237_v39, 0.0  ;;  %v370_v39 = vld [vmem:[%s987_s5 + $0x1c8] sm:$0xff] }
 0x187   :  { %413 = vmatpush.msra.mxu2 %v332_v37  ;;  %447 = vmatpush.msrb.mxu0 %v370_v39  ;;  %v550_v39 = vld [vmem:[%s990_s8] ss:$0 sm:$0xff] }
 0x188   :  { %v271_v45 = vrot.slane %v739_v40, 6  ;;  %v267_v46 = vrot.slane %v739_v40, 4  ;;  %v263_v49 = vrot.slane %v739_v40, 2 }
 0x18b   :  { %v239_v41 = vpop.f32.mrf.mxu0 }
 0x18c   :  { %v240_v42 = vadd.f32 %v548_v34, %v239_v41  ;;  %v318_v41 = vld [vmem:[%s987_s5 + $0x28] sm:$0xff] }
 0x18d   :  { %391 = vmatpush.msra.mxu1 %v318_v41 }
 0x18e   :  { %v741_v43 = vmax.f32 %v240_v42, 0.0  ;;  %v331_v42 = vld [vmem:[%s987_s5 + $0x90] sm:$0xff] }
 0x18f   :  { %414 = vmatpush.msra.mxu2 %v331_v42 }
 0x190   :  { %v284_v47 = vrot.slane %v741_v43, 6  ;;  %v280_v48 = vrot.slane %v741_v43, 4  ;;  %v276_v50 = vrot.slane %v741_v43, 2 }
 0x192   :  { %v536_v51 = vpack.i.bf16 %v284_v47, %v271_v45  ;;  %v531_v52 = vpack.i.bf16 %v280_v48, %v267_v46  ;;  %v526_v53 = vpack.i.bf16 %v276_v50, %v263_v49  ;;  %v369_v45 = vld [vmem:[%s987_s5 + $0x1c0] sm:$0xff]  ;;  %v330_v47 = vld [vmem:[%s987_s5 + $0x88] sm:$0xff]  ;;  %v368_v49 = vld [vmem:[%s987_s5 + $0x1b8] sm:$0xff] }
 0x193   :  { %v242_v54 = vpop.f32.mrf.mxu0  ;;  %v317_v46 = vld [vmem:[%s987_s5 + $0x20] sm:$0xff]  ;;  %v346_v48 = vld [vmem:[%s987_s5 + $0x108] sm:$0xff]  ;;  %448 = vmatpush.msrb.mxu0 %v369_v45  ;;  %v316_v50 = vld [vmem:[%s987_s5 + $0x18] sm:$0xff]  ;;  %415 = vmatpush.msra.mxu2 %v330_v47 }
 0x194   :  { %v243_v56 = vadd.f32 %v548_v34, %v242_v54  ;;  %537 = vrot.lane.b32.xlu1 %v536_v51, %s582_s4  ;;  %532 = vrot.lane.b32.xlu0 %v531_v52, %s581_s2  ;;  %v349_v34 = vld [vmem:[%s987_s5 + $0x120] sm:$0xff]  ;;  %v315_v54 = vld [vmem:[%s987_s5 + $0x10] sm:$0xff] }
 0x195   :  { %527 = vrot.lane.b32.xlu2 %v526_v53, %s580_s1  ;;  %432 = vmatpush.msra.mxu3 %v349_v34  ;;  %v329_v51 = vld [vmem:[%s987_s5 + $0x80] sm:$0xff]  ;;  %v367_v53 = vld [vmem:[%s987_s5 + $0x1b0] sm:$0xff] }
 0x196   :  { %v753_v57 = vmax.f32 %v243_v56, 0.0  ;;  %392 = vmatpush.msra.mxu1 %v317_v46  ;;  %v345_v52 = vld [vmem:[%s987_s5 + $0x100] sm:$0xff]  ;;  %449 = vmatpush.msrb.mxu0 %v368_v49  ;;  %v366_v56 = vld [vmem:[%s987_s5 + $0x1a8] sm:$0xff] }
 0x197   :  { %433 = vmatpush.msra.mxu3 %v348_v38  ;;  %416 = vmatpush.msra.mxu2 %v329_v51 }
 0x198   :  { %v289_v59 = vrot.slane %v753_v57, 2  ;;  %v297_v63 = vrot.slane %v753_v57, 6  ;;  %v293_v0 = vrot.slane %v753_v57, 4  ;;  %393 = vmatpush.msra.mxu1 %v316_v50  ;;  %450 = vmatpush.msrb.mxu0 %v367_v53 }
 0x199   :  { %434 = vmatpush.msra.mxu3 %v347_v44 }
 0x19a   :  { %v541_v62 = vpack.i.bf16 %v289_v59, %v250_v58  ;;  %v314_v58 = vld [vmem:[%s987_s5 + $0x8] sm:$0xff]  ;;  %394 = vmatpush.msra.mxu1 %v315_v54  ;;  %v365_v59 = vld [vmem:[%s987_s5 + $0x1a0] sm:$0xff]  ;;  %451 = vmatpush.msrb.mxu0 %v366_v56 }
 0x19b   :  { %435 = vmatpush.msra.mxu3 %v346_v48 }
 0x19c   :  { %259 = vrot.lane.b32.xlu1 %v258_v60, %s582_s4  ;;  %255 = vrot.lane.b32.xlu0 %v254_v61, %s581_s2  ;;  %v313_v60 = vld [vmem:[%s987_s5] sm:$0xff]  ;;  %v364_v61 = vld [vmem:[%s987_s5 + $0x198] sm:$0xff] }
 0x19d   :  { %542 = vrot.lane.b32.xlu2 %v541_v62, %s580_s1  ;;  %436 = vmatpush.msra.mxu3 %v345_v52  ;;  %v363_v62 = vld [vmem:[%s987_s5 + $0x190] sm:$0xff] }
 0x19e   :  { %395 = vmatpush.msra.mxu1 %v314_v58  ;;  %452 = vmatpush.msrb.mxu0 %v365_v59 }
 0x1a0   :  { %396 = vmatpush.msra.mxu1 %v313_v60  ;;  %453 = vmatpush.msrb.mxu0 %v364_v61 }
 0x1a2   :  { %454 = vmatpush.msrb.mxu0 %v363_v62 }
 0x1a4   :  { %298 = vrot.lane.b32.xlu0 %v297_v63, %s582_s4  ;;  %v362_v63 = vld [vmem:[%s987_s5 + $0x188] sm:$0xff] }
 0x1a5   :  { %294 = vrot.lane.b32.xlu2 %v293_v0, %s581_s2  ;;  %v361_v0 = vld [vmem:[%s987_s5 + $0x180] sm:$0xff]  ;;  %455 = vmatpush.msrb.mxu0 %v362_v63 }
 0x1a7   :  { %456 = vmatpush.msrb.mxu0 %v361_v0 }
 0x1ef   :  { %v528_v1 = vpop.permute.xlu2 %527 }
 0x1f0   :  { %v530_v2 = vunpack.i.h.bf16 %v528_v1  ;;  %v529_v3 = vunpack.i.l.bf16 %v528_v1 }
 0x1f2   :  { %v304_v11 = vsel %vm177_vm3, %v739_v40, %v529_v3  ;;  %v307_v12 = vsel %vm177_vm3, %v741_v43, %v530_v2 }
 0x1f7   :  { %v543_v6 = vpop.permute.xlu2 %542 }
 0x1f8   :  { %v544_v15 = vunpack.i.l.bf16 %v543_v6  ;;  %v545_v21 = vunpack.i.h.bf16 %v543_v6 }
 0x1fa   :  { %v301_v19 = vsel %vm177_vm3, %v749_v55, %v544_v15  ;;  %v310_v23 = vsel %vm177_vm3, %v753_v57, %v545_v21  ;;  %v465_v55 = vld [vmem:[%s989_s7 + $0x18] sm:$0xff]  ;;  %v463_v57 = vld [vmem:[%s989_s7 + $0x8] sm:$0xff]  ;;  %s583_s7 = smov [#allocation2]  }
 0x1fb   :  { %485 = vmatpush.msrb.mxu1 %v465_v55  ;;  %s500_s11 = sshll.u32 %s583_s7, 4  ;;  %s501_s11 = int_to_ptr.vmem [resolvable:$true] %s500_s11 }
 0x1fd   :  { %486 = vmatpush.msrb.mxu1 %v464_v27 }
 0x1ff   :  { %v295_v22 = vpop.permute.xlu2 %294  ;;  %487 = vmatpush.msrb.mxu1 %v463_v57 }
 0x200   :  { %v311_v24 = vsel %vm182_vm2, %v310_v23, %v295_v22 }
 0x201   :  { %488 = vmatpush.msrb.mxu1 %v462_v28 }
 0x206   :  { %v538_v4 = vpop.permute.xlu1 %537  ;;  %v533_v5 = vpop.permute.xlu0 %532 }
 0x207   :  { %v540_v7 = vunpack.i.h.bf16 %v538_v4  ;;  %v539_v8 = vunpack.i.l.bf16 %v538_v4  ;;  %v535_v9 = vunpack.i.h.bf16 %v533_v5  ;;  %v534_v10 = vunpack.i.l.bf16 %v533_v5 }
 0x209   :  { %v305_v13 = vsel %vm182_vm2, %v304_v11, %v534_v10  ;;  %v308_v14 = vsel %vm182_vm2, %v307_v12, %v535_v9 }
 0x20a   :  { %v306_v16 = vsel %vm203_vm4, %v305_v13, %v539_v8  ;;  %v309_v17 = vsel %vm203_vm4, %v308_v14, %v540_v7 }
 0x20b   :  { %417 = vmatmul.f32.vlgmr.msra.gmra.mxu2 %v306_v16  ;;  %437 = vmatmul.f32.vlgmr.msra.gmra.mxu3 %v309_v17 }
 0x20e   :  { %v260_v18 = vpop.permute.xlu1 %259  ;;  %v256_v20 = vpop.permute.xlu0 %255 }
 0x20f   :  { %v302_v40 = vsel %vm182_vm2, %v301_v19, %v256_v20 }
 0x210   :  { %v303_v43 = vsel %vm203_vm4, %v302_v40, %v260_v18 }
 0x211   :  { %397 = vmatmul.f32.vlgmr.msra.gmra.mxu1 %v303_v43 }
 0x216   :  { %v299_v25 = vpop.permute.xlu0 %298 }
 0x217   :  { %v312_v26 = vsel %vm203_vm4, %v311_v24, %v299_v25 }
 0x218   :  { %457 = vmatmul.f32.vlgmr.msrb.gmra.mxu0 %v312_v26 }
 0x28e   :  { %v398_v30 = vpop.f32.mrf.mxu1  ;;  %v418_v32 = vpop.f32.mrf.mxu2 }
 0x28f   :  { %v399_v31 = vadd.f32 %v549_v29, %v398_v30  ;;  %v438_v34 = vpop.f32.mrf.mxu3 }
 0x291   :  { %v419_v33 = vadd.f32 %v418_v32, %v399_v31 }
 0x293   :  { %v439_v35 = vadd.f32 %v438_v34, %v419_v33 }
 0x295   :  { %v458_v36 = vpop.f32.mrf.mxu0 }
 0x296   :  { %v459_v37 = vadd.f32 %v458_v36, %v439_v35 }
 0x298   :  { %v461_v38 = vmax.f32 %v459_v37, 0.0 }
 0x29a   :  { %515 = vmatmul.msk.f32.vlgmr.msrb.gmra.mxu1 %vm177_vm3, %v461_v38 }
 0x317   :  { %v490_v41 = vpop.f32.mrf.mxu1 }
 0x318   :  { %v491_v42 = vadd.f32 %v550_v39, %v490_v41 }
 0x31a   :  { %494 = vst.msk [vmem:[#allocation2] sm:$0x3] %vm493_vm5, %v491_v42 }
 0x31b   :  { %505 = dma.vmem_to_hbm [thread:$0]  %s501_s11, 32, %s503_s6, [#allocation3]  }
 0x31c   :  { %575 = dma.done.wait [#allocation3], 32  }
 0x31d   :  { %576 = vsyncadd [#allocation3], 4294967264 }
 0x31e   :  { %510 = vsyncpa [#allocation3], 1 }

</bundles_post_ra>
